<compile_context>
chip_gen: v7x
topology: tpu7x:2x2x1
jax: 0.10.0
libtpu: 0.0.40
codegen_flags: <defaults>
</compile_context>

<pallas_src>
import functools

import jax
import jax.numpy as jnp
from jax.experimental import pallas as pl
from jax.experimental.pallas import tpu as pltpu

# ----------------------------- config (small) -------------------------------
B = 2        # batch size
N = 8        # num panoramic views (sequence)
F_IMG = 64   # config.image_feat_size
F_ANG = 8    # config.angle_feat_size
H = 32       # config.hidden_size
LN_EPS = 1e-12


def _layernorm(x, gamma, beta, eps=LN_EPS):
    mu = jnp.mean(x, axis=-1, keepdims=True)
    xc = x - mu
    var = jnp.mean(xc * xc, axis=-1, keepdims=True)
    return xc * jax.lax.rsqrt(var + eps) * gamma + beta


# ------------------------- one-time parameter packing ------------------------
def prepare_visual_embedding_params(params):
    """Hoisted out of the per-call path: pack params + precompute cls row."""
    # weight slab: rows [0:F_img] = img linear, rows [F_img:] = ang linear
    w_slab = jnp.concatenate([params["w_img"], params["w_ang"]], axis=0)      # (F_img+F_ang, H)
    # small-row parameter slab (one DMA):
    #   0: b_img   1: b_ang   2: ln_img_g  3: ln_img_b
    #   4: ln_ang_g  5: ln_ang_b  6: type_emb  7: ln_g  8: ln_b
    p_slab = jnp.concatenate(
        [params["b_img"], params["b_ang"],
         params["ln_img_g"], params["ln_img_b"],
         params["ln_ang_g"], params["ln_ang_b"],
         params["type_emb"], params["ln_g"], params["ln_b"]], axis=0)         # (9, H)
    # cls path is parameter-only: compute once here, never inside the kernel.
    cls_row = _layernorm(params["cls_token"] + params["type_emb"],
                         params["ln_g"], params["ln_b"])                      # (1, H)
    return {"w_slab": w_slab, "p_slab": p_slab, "cls_row": cls_row}


# --------------------------------- kernel ------------------------------------
def _visual_emb_kernel(
    x_img_ref,   # (R, F_img)       flattened panoramic image features
    x_ang_ref,   # (R, F_ang)       flattened panoramic angle features
    w_ref,       # (F_img+F_ang, H) packed linear weights (row-concatenated)
    p_ref,       # (9, H)           packed small parameter rows
    step_ref,    # (B, H)           per-batch step embedding
    out_ref,     # (R, H)           pano embeddings
    *, f_img, n_views,
):
    # Two small matmuls against sublane-aligned row views of the weight slab
    # (F_img is a multiple of 8, so both slices are clean sublane blocks).
    y_img = jnp.dot(x_img_ref[...], w_ref[:f_img, :],
                    preferred_element_type=jnp.float32)                       # (R, H)
    y_ang = jnp.dot(x_ang_ref[...], w_ref[f_img:, :],
                    preferred_element_type=jnp.float32)                       # (R, H)

    # Static row views into the packed parameter slab (each (1, H)).
    b_img, b_ang = p_ref[0:1, :], p_ref[1:2, :]
    g_img, be_img = p_ref[2:3, :], p_ref[3:4, :]
    g_ang, be_ang = p_ref[4:5, :], p_ref[5:6, :]
    type_e = p_ref[6:7, :]
    g_f, be_f = p_ref[7:8, :], p_ref[8:9, :]

    img_n = _layernorm(y_img + b_img, g_img, be_img)                          # (R, H)
    ang_n = _layernorm(y_ang + b_ang, g_ang, be_ang)                          # (R, H)
    base = img_n + ang_n + type_e                                             # (R, H)

    # Per-batch step broadcast + final LayerNorm; each block is an 8-row
    # sublane-aligned slab (n_views = 8), so slices/stores are clean.
    bsz = step_ref.shape[0]
    for b in range(bsz):
        lo, hi = b * n_views, (b + 1) * n_views
        blk = base[lo:hi, :] + step_ref[b:b + 1, :]                           # (N, H)
        out_ref[lo:hi, :] = _layernorm(blk, g_f, be_f).astype(out_ref.dtype)
    # NOTE: dropout layers are identity (eval mode).


# -------------------------------- wrapper -------------------------------------
def visual_embeddings_pallas(pano_img_feats, pano_ang_feats, step_embedding,
                             prepared, batch_size):
    bsz, n, fi = pano_img_feats.shape
    fa = pano_ang_feats.shape[-1]
    hd = prepared["w_slab"].shape[1]
    r = bsz * n
    dt = pano_img_feats.dtype

    # Free reshapes (bitcasts) only -- no per-call parameter rebuilding.
    x_img = pano_img_feats.reshape(r, fi)
    x_ang = pano_ang_feats.reshape(r, fa)
    step = step_embedding.reshape(bsz, hd)

    flops = 2 * r * (fi + fa) * hd + 16 * r * hd
    bytes_accessed = 4 * (x_img.size + x_ang.size + prepared["w_slab"].size +
                          prepared["p_slab"].size + step.size + r * hd)

    kernel = functools.partial(_visual_emb_kernel, f_img=fi, n_views=n)
    pano_flat = pl.pallas_call(
        kernel,
        out_shape=jax.ShapeDtypeStruct((r, hd), dt),
        cost_estimate=pl.CostEstimate(flops=flops,
                                      transcendentals=3 * r,
                                      bytes_accessed=bytes_accessed),
        compiler_params=pltpu.CompilerParams(vmem_limit_bytes=2 * 1024 * 1024),
    )(x_img, x_ang, prepared["w_slab"], prepared["p_slab"], step)

    pano = pano_flat.reshape(bsz, n, hd)
    # torch broadcasting quirk: (B,1,H) + (B,H) -> (B,B,H); all rows identical.
    cls = jnp.broadcast_to(prepared["cls_row"], (batch_size, batch_size, hd)).astype(dt)
    return cls, pano


# --------------------------- pure-JAX reference -------------------------------
def visual_embeddings_ref(pano_img, pano_ang, step_emb, p, batch_size):
    hd = p["w_img"].shape[1]
    # type ids are all zero -> embedding lookup is row 0, unsqueeze(1)
    type_embeddings = jnp.broadcast_to(p["type_emb"][None, :, :],
                                       (batch_size, 1, hd))                   # (B,1,H)
    cls_expand = jnp.broadcast_to(p["cls_token"][None, :, :],
                                  (batch_size, 1, hd))                        # (B,1,H)
    cls_sum = cls_expand + type_embeddings[:, 0, :]                           # -> (B,B,H)
    cls_embeddings = _layernorm(cls_sum, p["ln_g"][0], p["ln_b"][0])

    img_p = pano_img @ p["w_img"] + p["b_img"][0]
    ang_p = pano_ang @ p["w_ang"] + p["b_ang"][0]
    pano = (_layernorm(img_p, p["ln_img_g"][0], p["ln_img_b"][0])
            + _layernorm(ang_p, p["ln_ang_g"][0], p["ln_ang_b"][0])
            + type_embeddings)
    pano = pano + step_emb
    pano = _layernorm(pano, p["ln_g"][0], p["ln_b"][0])
    return cls_embeddings, pano


if __name__ == "__main__":
    key = jax.random.PRNGKey(0)
    ks = jax.random.split(key, 16)

    def init(k, shape, scale=0.02):
        return (scale * jax.random.normal(k, shape)).astype(jnp.float32)

    params = {
        "cls_token": init(ks[0], (1, H)),
        "w_img": init(ks[1], (F_IMG, H)), "b_img": init(ks[2], (1, H)),
        "ln_img_g": (1.0 + 0.1 * jax.random.normal(ks[3], (1, H))).astype(jnp.float32),
        "ln_img_b": init(ks[4], (1, H), scale=0.05),
        "w_ang": init(ks[5], (F_ANG, H)), "b_ang": init(ks[6], (1, H)),
        "ln_ang_g": (1.0 + 0.1 * jax.random.normal(ks[7], (1, H))).astype(jnp.float32),
        "ln_ang_b": init(ks[8], (1, H), scale=0.05),
        "type_emb": init(ks[9], (1, H)),
        "ln_g": (1.0 + 0.1 * jax.random.normal(ks[10], (1, H))).astype(jnp.float32),
        "ln_b": init(ks[11], (1, H), scale=0.05),
    }

    pano_img = jax.random.normal(ks[12], (B, N, F_IMG), dtype=jnp.float32)
    pano_ang = jax.random.normal(ks[13], (B, N, F_ANG), dtype=jnp.float32)
    step_emb = init(ks[14], (B, 1, H), scale=0.1)

    # One-time parameter packing (hoisted out of the per-call path).
    prepared = jax.block_until_ready(prepare_visual_embedding_params(params))

    run = jax.jit(visual_embeddings_pallas, static_argnums=(4,))
    cls_out, pano_out = run(pano_img, pano_ang, step_emb, prepared, B)
    cls_out, pano_out = jax.block_until_ready((cls_out, pano_out))

    cls_ref, pano_ref = visual_embeddings_ref(pano_img, pano_ang, step_emb,
                                              params, B)
    assert cls_out.shape == cls_ref.shape and pano_out.shape == pano_ref.shape
    assert jnp.allclose(cls_out, cls_ref, atol=1e-4, rtol=1e-4), "cls mismatch"
    assert jnp.allclose(pano_out, pano_ref, atol=1e-4, rtol=1e-4), "pano mismatch"

    print("KERNEL_OK")
</pallas_src>

<mosaic_0001>
module attributes {stable_mosaic.version = 11 : i64} {
  func.func @_visual_emb_kernel(%arg0: memref<16x64xf32, #tpu.memory_space<vmem>>, %arg1: memref<16x8xf32, #tpu.memory_space<vmem>>, %arg2: memref<72x32xf32, #tpu.memory_space<vmem>>, %arg3: memref<9x32xf32, #tpu.memory_space<vmem>>, %arg4: memref<2x32xf32, #tpu.memory_space<vmem>>, %arg5: memref<16x32xf32, #tpu.memory_space<vmem>>) attributes {dimension_semantics = [], scalar_prefetch = 0 : i64, scratch_operands = 0 : i64, tpu.core_type = #tpu.core_type<tc>} {
    %c0 = arith.constant 0 : index
    %c0_0 = arith.constant 0 : index
    %0 = vector.load %arg0[%c0, %c0_0] : memref<16x64xf32, #tpu.memory_space<vmem>>, vector<16x64xf32>
    %c0_1 = arith.constant 0 : index
    %c0_2 = arith.constant 0 : index
    %1 = vector.load %arg2[%c0_1, %c0_2] : memref<72x32xf32, #tpu.memory_space<vmem>>, vector<64x32xf32>
    %cst = arith.constant dense<0.000000e+00> : vector<16x32xf32>
    %2 = tpu.matmul %0, %1, %cst {dimension_numbers = #tpu.dot_dimension_numbers<[1], [0], [0], [1], [0, 0, 1, 1], [], []>} : vector<16x64xf32>, vector<64x32xf32>, vector<16x32xf32> -> vector<16x32xf32>
    %c0_3 = arith.constant 0 : index
    %c0_4 = arith.constant 0 : index
    %3 = vector.load %arg1[%c0_3, %c0_4] : memref<16x8xf32, #tpu.memory_space<vmem>>, vector<16x8xf32>
    %c64 = arith.constant 64 : index
    %c0_5 = arith.constant 0 : index
    %4 = vector.load %arg2[%c64, %c0_5] : memref<72x32xf32, #tpu.memory_space<vmem>>, vector<8x32xf32>
    %cst_6 = arith.constant dense<0.000000e+00> : vector<16x32xf32>
    %5 = tpu.matmul %3, %4, %cst_6 {dimension_numbers = #tpu.dot_dimension_numbers<[1], [0], [0], [1], [0, 0, 1, 1], [], []>} : vector<16x8xf32>, vector<8x32xf32>, vector<16x32xf32> -> vector<16x32xf32>
    %c0_7 = arith.constant 0 : index
    %c0_8 = arith.constant 0 : index
    %6 = vector.load %arg3[%c0_7, %c0_8] : memref<9x32xf32, #tpu.memory_space<vmem>>, vector<1x32xf32>
    %c1 = arith.constant 1 : index
    %c0_9 = arith.constant 0 : index
    %7 = vector.load %arg3[%c1, %c0_9] : memref<9x32xf32, #tpu.memory_space<vmem>>, vector<1x32xf32>
    %c2 = arith.constant 2 : index
    %c0_10 = arith.constant 0 : index
    %8 = vector.load %arg3[%c2, %c0_10] : memref<9x32xf32, #tpu.memory_space<vmem>>, vector<1x32xf32>
    %c3 = arith.constant 3 : index
    %c0_11 = arith.constant 0 : index
    %9 = vector.load %arg3[%c3, %c0_11] : memref<9x32xf32, #tpu.memory_space<vmem>>, vector<1x32xf32>
    %c4 = arith.constant 4 : index
    %c0_12 = arith.constant 0 : index
    %10 = vector.load %arg3[%c4, %c0_12] : memref<9x32xf32, #tpu.memory_space<vmem>>, vector<1x32xf32>
    %c5 = arith.constant 5 : index
    %c0_13 = arith.constant 0 : index
    %11 = vector.load %arg3[%c5, %c0_13] : memref<9x32xf32, #tpu.memory_space<vmem>>, vector<1x32xf32>
    %c6 = arith.constant 6 : index
    %c0_14 = arith.constant 0 : index
    %12 = vector.load %arg3[%c6, %c0_14] : memref<9x32xf32, #tpu.memory_space<vmem>>, vector<1x32xf32>
    %c7 = arith.constant 7 : index
    %c0_15 = arith.constant 0 : index
    %13 = vector.load %arg3[%c7, %c0_15] : memref<9x32xf32, #tpu.memory_space<vmem>>, vector<1x32xf32>
    %c8 = arith.constant 8 : index
    %c0_16 = arith.constant 0 : index
    %14 = vector.load %arg3[%c8, %c0_16] : memref<9x32xf32, #tpu.memory_space<vmem>>, vector<1x32xf32>
    %15 = vector.broadcast %6 : vector<1x32xf32> to vector<16x32xf32>
    %16 = arith.addf %2, %15 : vector<16x32xf32>
    %cst_17 = arith.constant dense<0.000000e+00> : vector<16xf32>
    %17 = vector.multi_reduction <add>, %16, %cst_17 [1] : vector<16x32xf32> to vector<16xf32>
    %18 = vector.shape_cast %17 : vector<16xf32> to vector<16x1xf32>
    %cst_18 = arith.constant 3.200000e+01 : f32
    %19 = vector.broadcast %cst_18 : f32 to vector<16x1xf32>
    %20 = arith.divf %18, %19 : vector<16x1xf32>
    %21 = vector.broadcast %20 : vector<16x1xf32> to vector<16x32xf32>
    %22 = arith.subf %16, %21 : vector<16x32xf32>
    %23 = arith.mulf %22, %22 : vector<16x32xf32>
    %cst_19 = arith.constant dense<0.000000e+00> : vector<16xf32>
    %24 = vector.multi_reduction <add>, %23, %cst_19 [1] : vector<16x32xf32> to vector<16xf32>
    %25 = vector.shape_cast %24 : vector<16xf32> to vector<16x1xf32>
    %cst_20 = arith.constant 3.200000e+01 : f32
    %26 = vector.broadcast %cst_20 : f32 to vector<16x1xf32>
    %27 = arith.divf %25, %26 : vector<16x1xf32>
    %cst_21 = arith.constant 9.99999996E-13 : f32
    %28 = vector.broadcast %cst_21 : f32 to vector<16x1xf32>
    %29 = arith.addf %27, %28 : vector<16x1xf32>
    %30 = math.rsqrt %29 : vector<16x1xf32>
    %31 = vector.broadcast %30 : vector<16x1xf32> to vector<16x32xf32>
    %32 = arith.mulf %22, %31 : vector<16x32xf32>
    %33 = vector.broadcast %8 : vector<1x32xf32> to vector<16x32xf32>
    %34 = arith.mulf %32, %33 : vector<16x32xf32>
    %35 = vector.broadcast %9 : vector<1x32xf32> to vector<16x32xf32>
    %36 = arith.addf %34, %35 : vector<16x32xf32>
    %37 = vector.broadcast %7 : vector<1x32xf32> to vector<16x32xf32>
    %38 = arith.addf %5, %37 : vector<16x32xf32>
    %cst_22 = arith.constant dense<0.000000e+00> : vector<16xf32>
    %39 = vector.multi_reduction <add>, %38, %cst_22 [1] : vector<16x32xf32> to vector<16xf32>
    %40 = vector.shape_cast %39 : vector<16xf32> to vector<16x1xf32>
    %cst_23 = arith.constant 3.200000e+01 : f32
    %41 = vector.broadcast %cst_23 : f32 to vector<16x1xf32>
    %42 = arith.divf %40, %41 : vector<16x1xf32>
    %43 = vector.broadcast %42 : vector<16x1xf32> to vector<16x32xf32>
    %44 = arith.subf %38, %43 : vector<16x32xf32>
    %45 = arith.mulf %44, %44 : vector<16x32xf32>
    %cst_24 = arith.constant dense<0.000000e+00> : vector<16xf32>
    %46 = vector.multi_reduction <add>, %45, %cst_24 [1] : vector<16x32xf32> to vector<16xf32>
    %47 = vector.shape_cast %46 : vector<16xf32> to vector<16x1xf32>
    %cst_25 = arith.constant 3.200000e+01 : f32
    %48 = vector.broadcast %cst_25 : f32 to vector<16x1xf32>
    %49 = arith.divf %47, %48 : vector<16x1xf32>
    %cst_26 = arith.constant 9.99999996E-13 : f32
    %50 = vector.broadcast %cst_26 : f32 to vector<16x1xf32>
    %51 = arith.addf %49, %50 : vector<16x1xf32>
    %52 = math.rsqrt %51 : vector<16x1xf32>
    %53 = vector.broadcast %52 : vector<16x1xf32> to vector<16x32xf32>
    %54 = arith.mulf %44, %53 : vector<16x32xf32>
    %55 = vector.broadcast %10 : vector<1x32xf32> to vector<16x32xf32>
    %56 = arith.mulf %54, %55 : vector<16x32xf32>
    %57 = vector.broadcast %11 : vector<1x32xf32> to vector<16x32xf32>
    %58 = arith.addf %56, %57 : vector<16x32xf32>
    %59 = arith.addf %36, %58 : vector<16x32xf32>
    %60 = vector.broadcast %12 : vector<1x32xf32> to vector<16x32xf32>
    %61 = arith.addf %59, %60 : vector<16x32xf32>
    %62 = vector.extract_strided_slice %61 {offsets = [0, 0], sizes = [8, 32], strides = [1, 1]} : vector<16x32xf32> to vector<8x32xf32>
    %c0_27 = arith.constant 0 : index
    %c0_28 = arith.constant 0 : index
    %63 = vector.load %arg4[%c0_27, %c0_28] : memref<2x32xf32, #tpu.memory_space<vmem>>, vector<1x32xf32>
    %64 = vector.broadcast %63 : vector<1x32xf32> to vector<8x32xf32>
    %65 = arith.addf %62, %64 : vector<8x32xf32>
    %cst_29 = arith.constant dense<0.000000e+00> : vector<8xf32>
    %66 = vector.multi_reduction <add>, %65, %cst_29 [1] : vector<8x32xf32> to vector<8xf32>
    %67 = vector.shape_cast %66 : vector<8xf32> to vector<8x1xf32>
    %cst_30 = arith.constant 3.200000e+01 : f32
    %68 = vector.broadcast %cst_30 : f32 to vector<8x1xf32>
    %69 = arith.divf %67, %68 : vector<8x1xf32>
    %70 = vector.broadcast %69 : vector<8x1xf32> to vector<8x32xf32>
    %71 = arith.subf %65, %70 : vector<8x32xf32>
    %72 = arith.mulf %71, %71 : vector<8x32xf32>
    %cst_31 = arith.constant dense<0.000000e+00> : vector<8xf32>
    %73 = vector.multi_reduction <add>, %72, %cst_31 [1] : vector<8x32xf32> to vector<8xf32>
    %74 = vector.shape_cast %73 : vector<8xf32> to vector<8x1xf32>
    %cst_32 = arith.constant 3.200000e+01 : f32
    %75 = vector.broadcast %cst_32 : f32 to vector<8x1xf32>
    %76 = arith.divf %74, %75 : vector<8x1xf32>
    %cst_33 = arith.constant 9.99999996E-13 : f32
    %77 = vector.broadcast %cst_33 : f32 to vector<8x1xf32>
    %78 = arith.addf %76, %77 : vector<8x1xf32>
    %79 = math.rsqrt %78 : vector<8x1xf32>
    %80 = vector.broadcast %79 : vector<8x1xf32> to vector<8x32xf32>
    %81 = arith.mulf %71, %80 : vector<8x32xf32>
    %82 = vector.broadcast %13 : vector<1x32xf32> to vector<8x32xf32>
    %83 = arith.mulf %81, %82 : vector<8x32xf32>
    %84 = vector.broadcast %14 : vector<1x32xf32> to vector<8x32xf32>
    %85 = arith.addf %83, %84 : vector<8x32xf32>
    %c0_34 = arith.constant 0 : index
    %c0_35 = arith.constant 0 : index
    %86 = vector.load %arg5[%c0_34, %c0_35] : memref<16x32xf32, #tpu.memory_space<vmem>>, vector<8x32xf32>
    tpu.vector_store %arg5[%c0_34, %c0_35], %85 {strides = array<i32>} : memref<16x32xf32, #tpu.memory_space<vmem>>, vector<8x32xf32>,
    %87 = vector.extract_strided_slice %61 {offsets = [8, 0], sizes = [8, 32], strides = [1, 1]} : vector<16x32xf32> to vector<8x32xf32>
    %c1_36 = arith.constant 1 : index
    %c0_37 = arith.constant 0 : index
    %88 = vector.load %arg4[%c1_36, %c0_37] : memref<2x32xf32, #tpu.memory_space<vmem>>, vector<1x32xf32>
    %89 = vector.broadcast %88 : vector<1x32xf32> to vector<8x32xf32>
    %90 = arith.addf %87, %89 : vector<8x32xf32>
    %cst_38 = arith.constant dense<0.000000e+00> : vector<8xf32>
    %91 = vector.multi_reduction <add>, %90, %cst_38 [1] : vector<8x32xf32> to vector<8xf32>
    %92 = vector.shape_cast %91 : vector<8xf32> to vector<8x1xf32>
    %cst_39 = arith.constant 3.200000e+01 : f32
    %93 = vector.broadcast %cst_39 : f32 to vector<8x1xf32>
    %94 = arith.divf %92, %93 : vector<8x1xf32>
    %95 = vector.broadcast %94 : vector<8x1xf32> to vector<8x32xf32>
    %96 = arith.subf %90, %95 : vector<8x32xf32>
    %97 = arith.mulf %96, %96 : vector<8x32xf32>
    %cst_40 = arith.constant dense<0.000000e+00> : vector<8xf32>
    %98 = vector.multi_reduction <add>, %97, %cst_40 [1] : vector<8x32xf32> to vector<8xf32>
    %99 = vector.shape_cast %98 : vector<8xf32> to vector<8x1xf32>
    %cst_41 = arith.constant 3.200000e+01 : f32
    %100 = vector.broadcast %cst_41 : f32 to vector<8x1xf32>
    %101 = arith.divf %99, %100 : vector<8x1xf32>
    %cst_42 = arith.constant 9.99999996E-13 : f32
    %102 = vector.broadcast %cst_42 : f32 to vector<8x1xf32>
    %103 = arith.addf %101, %102 : vector<8x1xf32>
    %104 = math.rsqrt %103 : vector<8x1xf32>
    %105 = vector.broadcast %104 : vector<8x1xf32> to vector<8x32xf32>
    %106 = arith.mulf %96, %105 : vector<8x32xf32>
    %107 = vector.broadcast %13 : vector<1x32xf32> to vector<8x32xf32>
    %108 = arith.mulf %106, %107 : vector<8x32xf32>
    %109 = vector.broadcast %14 : vector<1x32xf32> to vector<8x32xf32>
    %110 = arith.addf %108, %109 : vector<8x32xf32>
    %c8_43 = arith.constant 8 : index
    %c0_44 = arith.constant 0 : index
    %111 = vector.load %arg5[%c8_43, %c0_44] : memref<16x32xf32, #tpu.memory_space<vmem>>, vector<8x32xf32>
    tpu.vector_store %arg5[%c8_43, %c0_44], %110 {strides = array<i32>} : memref<16x32xf32, #tpu.memory_space<vmem>>, vector<8x32xf32>,
    return
  }
}

</mosaic_0001>

<bundles_post_ra>
// kernel: visual_embeddings_pallas.1
= control target key start
LH: loop header
LB: loop body
LE: loop exit
PB: predicated region body
PF: predicated region fallthrough
CT: control target
= control target key end

     0   :  { %vm173_vm0 = vcmask 64512   ;;  %vm47_vm1 = vcmask 523264   ;;  %s609_s0 = inlined_call_operand.vmem [shape: f32[16,64], index: 0, kind: input, shape index: {}]   ;;  %s610_s1 = inlined_call_operand.vmem [shape: f32[16,8], index: 1, kind: input, shape index: {}]   ;;  %s611_s2 = inlined_call_operand.vmem [shape: f32[72,32], index: 2, kind: input, shape index: {}]   ;;  %s612_s3 = inlined_call_operand.vmem [shape: f32[9,32], index: 3, kind: input, shape index: {}]   ;;  %s613_s4 = inlined_call_operand.vmem [shape: f32[2,32], index: 4, kind: input, shape index: {}]   ;;  %s614_s5 = inlined_call_operand.hbm [shape: f32[16,32], index: 5, kind: output, shape index: {}]  }
   0x1   :  { %v33_v0 = vld [vmem:[%s611_s2 + $0x40] sm:$0xff]  ;;  %v24_v3 = vld [vmem:[%s611_s2 + $0x8] sm:$0xff]  ;;  %v25_v5 = vld [vmem:[%s611_s2 + $0x10] sm:$0xff] }
   0x2   :  { %v31_v1 = vld [vmem:[%s610_s1] sm:$0xff]  ;;  %416 = vmatprep.subr.mxu1 %v33_v0  ;;  %v32_v4 = vld [vmem:[%s610_s1 + $0x8] sm:$0xff]  ;;  %v26_v7 = vld [vmem:[%s611_s2 + $0x18] sm:$0xff] }
   0x3   :  { %v23_v2 = vld [vmem:[%s611_s2] sm:$0xff]  ;;  %418 = vmatprep.mubr.msk.f32.mxu1 %vm173_vm0, %v31_v1  ;;  %417 = vmatpush3.msra.mxu1 %v33_v0  ;;  %v425_v8 = vpack.c.bf16 %v26_v7, %v25_v5  ;;  %v28_v10 = vld [vmem:[%s611_s2 + $0x28] sm:$0xff] }
   0x4   :  { %v421_v6 = vpack.c.bf16 %v24_v3, %v23_v2  ;;  %419 = vmatmul.mubr.msk.f32.vlgmr.msra.gmra.mrb[0].mxu1 %vm173_vm0, %v32_v4  ;;  %v27_v9 = vld [vmem:[%s611_s2 + $0x20] sm:$0xff] }
   0x5   :  { %v21_v11 = vld [vmem:[%s609_s0] sm:$0xff] }
   0x6   :  { %422 = vmatprep.subr.bf16.mxu0 %v421_v6  ;;  %413 = vmatprep.mubr.msk.f32.mxu0 %vm47_vm1, %v21_v11 }
   0x7   :  { %10 = vsyncpa [#allocation3], 0  ;;  %424 = vmatpush3.bf16.msra.mxu0 %v421_v6  ;;  %v429_v12 = vpack.c.bf16 %v28_v10, %v27_v9  ;;  %v29_v13 = vld [vmem:[%s611_s2 + $0x30] sm:$0xff]  ;;  %v30_v14 = vld [vmem:[%s611_s2 + $0x38] sm:$0xff]  ;;  %vm129_vm2 = vcmask 261120   ;;  %s476_s11 = smov [#allocation2]  }
   0x8   :  { %426 = vmatprep.subr.bf16.mxu0 %v425_v8  ;;  %v433_v15 = vpack.c.bf16 %v30_v14, %v29_v13  ;;  %v22_v16 = vld [vmem:[%s609_s0 + $0x8] sm:$0xff]  ;;  %v374_v17 = vld [vmem:[%s612_s3 + $0x1] ss:$0 sm:$0xff]  ;;  %v369_v24 = vld [vmem:[%s612_s3] ss:$0 sm:$0xff]  ;;  %s358_s12 = sshll.u32 %s476_s11, 4  ;;  %s359_s12 = int_to_ptr.vmem [resolvable:$true] %s358_s12 }
   0x9   :  { %v372_v1 = vld [vmem:[%s612_s3 + $0x2] ss:$0 sm:$0xff]  ;;  %v377_v4 = vld [vmem:[%s612_s3 + $0x4] ss:$0 sm:$0xff]  ;;  %v378_v9 = vld [vmem:[%s612_s3 + $0x5] ss:$0 sm:$0xff]  ;;  %p457_p1 = scmp.lt.s32.totalorder %s359_s12, %s359_s12 }
   0xa   :  { %s452_s13 = scalar_lea.vmem %s359_s12, 256 }
   0xb   :  { %428 = vmatpush3.bf16.msra.mxu0 %v425_v8  ;;  %v373_v8 = vld [vmem:[%s612_s3 + $0x3] ss:$0 sm:$0xff]  ;;  %p453_p0 = scmp.ne.s32.totalorder %s359_s12, %s452_s13  ;;  %p458_p2 = scmp.lt.s32.totalorder %s452_s13, %s452_s13 }
   0xc   :  { %430 = vmatprep.subr.bf16.mxu0 %v429_v12 }
   0xd   :  { %p459_p3 = por %p458_p2, %p457_p1 }
   0xf   :  { %432 = vmatpush3.bf16.msra.mxu0 %v429_v12  ;;  %p460_p4 = pnand %p459_p3, %p453_p0 }
  0x10   :  { %434 = vmatprep.subr.bf16.mxu0 %v433_v15 }
  0x13   :  { %436 = vmatpush3.bf16.msra.mxu0 %v433_v15 }
  0x16   :  { %414 = vmatmul.mubr.msk.f32.vlgmr.msra.gmra.mrb[0].mxu0 %vm47_vm1, %v22_v16  ;;  %v379_v16 = vld [vmem:[%s612_s3 + $0x6] ss:$0 sm:$0xff] }
  0xd7   :  { %v420_v18 = vpop.f32.mrb[0].mxu1 }
  0xd8   :  { %v246_v19 = vpop.f32.mrb[1].mxu1  ;;  %v252_v20 = vadd.f32 %v420_v18, %v374_v17 }
  0xd9   :  { %v247_v21 = vadd.f32 %v374_v17, %v246_v19  ;;  %v380_v19 = vld [vmem:[%s613_s4] ss:$0 sm:$0xff] }
  0xda   :  { %v258_v23 = vsel %vm129_vm2, %v252_v20, 0.0 }
  0xdb   :  { %v255_v22 = vsel %vm129_vm2, %v247_v21, 0.0 }
  0xdc   :  { %256 = vadd.xlane.f32.xlu1 %v255_v22 }
  0xe0   :  { %259 = vadd.xlane.f32.xlu1 %v258_v23 }
  0xe9   :  { %v415_v25 = vpop.f32.mrb[0].mxu0 }
  0xea   :  { %v120_v26 = vpop.f32.mrb[1].mxu0  ;;  %v126_v28 = vadd.f32 %v415_v25, %v369_v24  ;;  %v383_v25 = vld [vmem:[%s613_s4 + $0x1] ss:$0 sm:$0xff] }
  0xeb   :  { %v121_v27 = vadd.f32 %v369_v24, %v120_v26 }
  0xec   :  { %v133_v30 = vsel %vm129_vm2, %v126_v28, 0.0 }
  0xed   :  { %v130_v29 = vsel %vm129_vm2, %v121_v27, 0.0 }
  0xee   :  { %131 = vadd.xlane.f32.xlu0 %v130_v29 }
  0xf2   :  { %134 = vadd.xlane.f32.xlu0 %v133_v30 }
 0x169   :  { %v257_v31 = vpop.xlane.xlu1 %256 }
 0x16a   :  { %v261_v32 = vmul.f32 0.03125, %v257_v31 }
 0x16c   :  { %v263_v36 = vsub.f32 %v247_v21, %v261_v32 }
 0x16d   :  { %v260_v33 = vpop.xlane.xlu1 %259 }
 0x16e   :  { %v262_v37 = vmul.f32 0.03125, %v260_v33  ;;  %v265_v45 = vmul.f32 %v263_v36, %v263_v36 }
 0x170   :  { %v264_v42 = vsub.f32 %v252_v20, %v262_v37  ;;  %v267_v47 = vsel %vm129_vm2, %v265_v45, 0.0 }
 0x172   :  { %v266_v49 = vmul.f32 %v264_v42, %v264_v42 }
 0x174   :  { %v270_v50 = vsel %vm129_vm2, %v266_v49, 0.0  ;;  %v382_v49 = vld [vmem:[%s612_s3 + $0x8] ss:$0 sm:$0xff] }
 0x17b   :  { %v132_v34 = vpop.xlane.xlu0 %131 }
 0x17c   :  { %v137_v35 = vmul.f32 0.03125, %v132_v34 }
 0x17e   :  { %v139_v38 = vsub.f32 %v121_v27, %v137_v35 }
 0x17f   :  { %v135_v39 = vpop.xlane.xlu0 %134 }
 0x180   :  { %v138_v40 = vmul.f32 0.03125, %v135_v39  ;;  %v141_v41 = vmul.f32 %v139_v38, %v139_v38 }
 0x182   :  { %v140_v43 = vsub.f32 %v126_v28, %v138_v40  ;;  %v143_v44 = vsel %vm129_vm2, %v141_v41, 0.0 }
 0x183   :  { %144 = vadd.xlane.f32.xlu0 %v143_v44 }
 0x184   :  { %v142_v46 = vmul.f32 %v140_v43, %v140_v43 }
 0x186   :  { %v146_v48 = vsel %vm129_vm2, %v142_v46, 0.0 }
 0x187   :  { %268 = vadd.xlane.f32.xlu0 %v267_v47  ;;  %147 = vadd.xlane.f32.xlu1 %v146_v48  ;;  %v381_v47 = vld [vmem:[%s612_s3 + $0x7] ss:$0 sm:$0xff] }
 0x18b   :  { %271 = vadd.xlane.f32.xlu1 %v270_v50 }
 0x210   :  { %v145_v51 = vpop.xlane.xlu0 %144 }
 0x211   :  { %v149_v52 = vmul.f32 0.03125, %v145_v51 }
 0x213   :  { %v151_v53 = vadd.f32 1e-12, %v149_v52 }
 0x214   :  { %v148_v54 = vpop.xlane.xlu1 %147  ;;  %v269_v55 = vpop.xlane.xlu0 %268 }
 0x215   :  { %440 = vrsqrt.f32 %v151_v53  ;;  %v150_v56 = vmul.f32 0.03125, %v148_v54  ;;  %v273_v57 = vmul.f32 0.03125, %v269_v55 }
 0x217   :  { %v152_v58 = vadd.f32 1e-12, %v150_v56  ;;  %v275_v59 = vadd.f32 1e-12, %v273_v57 }
 0x218   :  { %v272_v60 = vpop.xlane.xlu1 %271 }
 0x219   :  { %442 = vrsqrt.f32 %v152_v58  ;;  %v274_v61 = vmul.f32 0.03125, %v272_v60 }
 0x21a   :  { %444 = vrsqrt.f32 %v275_v59 }
 0x21b   :  { %v276_v62 = vadd.f32 1e-12, %v274_v61 }
 0x21d   :  { %446 = vrsqrt.f32 %v276_v62 }
 0x21f   :  { %v441_v63 = vpop.eup %440 }
 0x220   :  { %v155_v0 = vmul.f32 %v441_v63, %v139_v38 }
 0x222   :  { %v161_v6 = vmul.f32 %v372_v1, %v155_v0 }
 0x223   :  { %v443_v2 = vpop.eup %442 }
 0x224   :  { %v445_v3 = vpop.eup %444  ;;  %v156_v5 = vmul.f32 %v443_v2, %v140_v43  ;;  %v167_v14 = vadd.f32 %v373_v8, %v161_v6 }
 0x225   :  { %v279_v7 = vmul.f32 %v445_v3, %v263_v36 }
 0x226   :  { %v162_v12 = vmul.f32 %v372_v1, %v156_v5 }
 0x227   :  { %v447_v10 = vpop.eup %446  ;;  %v285_v11 = vmul.f32 %v377_v4, %v279_v7 }
 0x228   :  { %v280_v13 = vmul.f32 %v447_v10, %v264_v42  ;;  %v168_v20 = vadd.f32 %v373_v8, %v162_v12 }
 0x229   :  { %v291_v15 = vadd.f32 %v378_v9, %v285_v11 }
 0x22a   :  { %v286_v17 = vmul.f32 %v377_v4, %v280_v13 }
 0x22b   :  { %v293_v18 = vadd.f32 %v291_v15, %v167_v14 }
 0x22c   :  { %v292_v21 = vadd.f32 %v378_v9, %v286_v17 }
 0x22d   :  { %v299_v22 = vadd.f32 %v379_v16, %v293_v18 }
 0x22e   :  { %v294_v23 = vadd.f32 %v292_v21, %v168_v20 }
 0x22f   :  { %v306_v24 = vadd.f32 %v380_v19, %v299_v22 }
 0x230   :  { %v300_v26 = vadd.f32 %v379_v16, %v294_v23 }
 0x231   :  { %v307_v27 = vsel %vm129_vm2, %v306_v24, 0.0 }
 0x232   :  { %308 = vadd.xlane.f32.xlu0 %v307_v27  ;;  %v336_v28 = vadd.f32 %v383_v25, %v300_v26 }
 0x234   :  { %v337_v29 = vsel %vm129_vm2, %v336_v28, 0.0 }
 0x235   :  { %338 = vadd.xlane.f32.xlu1 %v337_v29 }
 0x2bf   :  { %v309_v30 = vpop.xlane.xlu0 %308 }
 0x2c0   :  { %v310_v31 = vmul.f32 0.03125, %v309_v30 }
 0x2c2   :  { %v311_v32 = vsub.f32 %v306_v24, %v310_v31  ;;  %v339_v33 = vpop.xlane.xlu1 %338 }
 0x2c3   :  { %v340_v34 = vmul.f32 0.03125, %v339_v33 }
 0x2c4   :  { %v312_v35 = vmul.f32 %v311_v32, %v311_v32 }
 0x2c5   :  { %v341_v36 = vsub.f32 %v336_v28, %v340_v34 }
 0x2c6   :  { %v313_v37 = vsel %vm129_vm2, %v312_v35, 0.0 }
 0x2c7   :  { %314 = vadd.xlane.f32.xlu0 %v313_v37  ;;  %v342_v38 = vmul.f32 %v341_v36, %v341_v36 }
 0x2c9   :  { %v343_v39 = vsel %vm129_vm2, %v342_v38, 0.0 }
 0x2ca   :  { %344 = vadd.xlane.f32.xlu1 %v343_v39 }
 0x354   :  { %v315_v40 = vpop.xlane.xlu0 %314 }
 0x355   :  { %v316_v41 = vmul.f32 0.03125, %v315_v40 }
 0x357   :  { %v317_v42 = vadd.f32 1e-12, %v316_v41  ;;  %v345_v43 = vpop.xlane.xlu1 %344 }
 0x358   :  { %v346_v44 = vmul.f32 0.03125, %v345_v43 }
 0x359   :  { %448 = vrsqrt.f32 %v317_v42 }
 0x35a   :  { %v347_v45 = vadd.f32 1e-12, %v346_v44 }
 0x35c   :  { %450 = vrsqrt.f32 %v347_v45 }
 0x363   :  { %v449_v46 = vpop.eup %448 }
 0x364   :  { %v319_v48 = vmul.f32 %v449_v46, %v311_v32 }
 0x366   :  { %v451_v50 = vpop.eup %450  ;;  %v324_v51 = vmul.f32 %v381_v47, %v319_v48 }
 0x367   :  { %v349_v52 = vmul.f32 %v451_v50, %v341_v36 }
 0x368   :  { %v329_v53 = vadd.f32 %v382_v49, %v324_v51 }
 0x369   :  { %v350_v54 = vmul.f32 %v381_v47, %v349_v52 }
 0x36a   :  { %330 = vst.msk [vmem:[#allocation2] sm:$0xff] %vm129_vm2, %v329_v53 }
 0x36b   :  { %v351_v55 = vadd.f32 %v382_v49, %v350_v54 }
 0x36d   :  { %352 = vst.msk [vmem:[#allocation2 + $0x8] sm:$0xff] %vm129_vm2, %v351_v55 }
 0x36e   :  { %463 = shalt.err (!%p460_p4)
}
 0x36f   :  { %s464_s15 = scalar_lea.hbm %s614_s5, 256 }
 0x370   :  { %p465_p5 = scmp.ne.s32.totalorder %s614_s5, %s464_s15  ;;  %p468_p6 = scmp.lt.u32.totalorder %s464_s15, %s614_s5 }
 0x372   :  { %p470_p7 = pnand %p468_p6, %p465_p5 }
 0x374   :  { %473 = shalt.err (!%p470_p7)
}
 0x375   :  { %s477_s2 = smov 128   ;;  %s478_s20 = smov 8  }
 0x376   :  { %364 = dma.vmem_to_hbm [thread:$0]  %s359_s12, 256, %s614_s5, [#allocation3], %s477_s2, %s477_s2, %s478_s20  }
 0x377   :  { %474 = dma.done.wait [#allocation3], 256  }
 0x378   :  { %475 = vsyncadd [#allocation3], 4294967040 }
 0x379   :  { %368 = vsyncpa [#allocation3], 1 }

</bundles_post_ra>
